<compile_context>
chip_gen: v7x
topology: tpu7x:2x2x1
jax: 0.10.0
libtpu: 0.0.40
codegen_flags: <defaults>
</compile_context>

<pallas_src>
import jax
import jax.numpy as jnp
from jax.experimental import pallas as pl
from jax.experimental.pallas import tpu as pltpu


def _final_kernel(x_ref, shift_ref, scale1_ref, wlin_ref, blin_ref, o_ref):
    """Fused: LayerNorm(eps=1e-6, no affine) -> modulate(shift, 1+scale) -> Linear."""
    x = x_ref[0]                                        # (TILE_T, H), input dtype
    xf = x.astype(jnp.float32)

    # --- LayerNorm statistics in f32 (XLU reductions), one-pass variance ---
    mean = jnp.mean(xf, axis=-1, keepdims=True)
    meansq = jnp.mean(xf * xf, axis=-1, keepdims=True)
    var = jnp.maximum(meansq - mean * mean, 0.0)        # clamp: guards cancellation
    inv = jax.lax.rsqrt(var + 1e-6)

    # --- modulate_fused in the input dtype (bf16 VALU on v6e/v7x; f32 stays f32) ---
    cdt = x.dtype
    xn = (x - mean.astype(cdt)) * inv.astype(cdt)
    y = xn * scale1_ref[0].astype(cdt) + shift_ref[0].astype(cdt)   # (TILE_T, H)

    # --- final projection: input-dtype MXU operands, f32 accumulate, f32 bias ---
    out = jnp.dot(y, wlin_ref[...], preferred_element_type=jnp.float32) + blin_ref[...]
    o_ref[0] = out.astype(o_ref.dtype)


def _default_tile_cap():
    """1024-token tiles on 128-MiB VMEM parts (v5e/v6e); 512 on v7x (64 MiB/TC)."""
    try:
        vmem = int(pltpu.get_tpu_info().vmem_capacity_bytes)
        return 1024 if vmem >= 100 * 1024 * 1024 else 512
    except Exception:
        return 512


def _pick_tile_t(T, cap, dtype):
    """Largest divisor of T <= cap, preferring sublane-pack alignment.

    Never returns more than `cap` when T > cap (keeps VMEM bounded)."""
    if T <= cap:
        return T
    align = 16 if jnp.dtype(dtype).itemsize < 4 else 8   # bf16 packs 2 rows/sublane
    best_unaligned = 1
    for t in range(cap, 0, -1):
        if T % t == 0:
            if t % align == 0:
                return t
            if best_unaligned == 1:
                best_unaligned = t
    return best_unaligned


def final_layer(x, c, w_ada, b_ada, w_lin, b_lin, *, tile_t_cap=None):
    B, T, H = x.shape
    C = c.shape[-1]
    assert w_ada.shape == (C, 2 * H)
    P = w_lin.shape[1]

    # --- adaLN hoisted out of the kernel: one tiny f32 dot (B,C)@(C,2H) in XLA ---
    cf = c.astype(jnp.float32)
    s = cf * jax.nn.sigmoid(cf)                                   # SiLU
    mod = s @ w_ada.astype(jnp.float32) + b_ada.astype(jnp.float32)   # (B, 2H)
    shift = mod[:, :H].reshape(B, 1, H)                           # f32, tiny
    scale1 = (mod[:, H:] + 1.0).reshape(B, 1, H)                  # 1 + scale, f32

    # Cast projection weight once in the wrapper (VMEM/VPU cost independent of caller dtype).
    w_lin_k = w_lin.astype(x.dtype)
    b_lin_k = b_lin.astype(jnp.float32).reshape(1, P)

    if tile_t_cap is None:
        tile_t_cap = _default_tile_cap()
    tile_t = _pick_tile_t(T, tile_t_cap, x.dtype)
    grid = (B, T // tile_t)

    itemsize = jnp.dtype(x.dtype).itemsize
    cost = pl.CostEstimate(
        flops=2 * B * T * H * P + 8 * B * T * H,
        transcendentals=0,
        bytes_accessed=(B * T * H * itemsize            # x read
                        + B * T * P * itemsize          # out write
                        + H * P * itemsize + P * 4      # projection weights
                        + 2 * B * H * 4),               # shift / scale1
    )

    return pl.pallas_call(
        _final_kernel,
        out_shape=jax.ShapeDtypeStruct((B, T, P), x.dtype),
        grid=grid,
        in_specs=[
            pl.BlockSpec((1, tile_t, H), lambda b, t: (b, t, 0)),   # x tile
            pl.BlockSpec((1, 1, H), lambda b, t: (b, 0, 0)),        # shift   (per-sample)
            pl.BlockSpec((1, 1, H), lambda b, t: (b, 0, 0)),        # 1+scale (per-sample)
            pl.BlockSpec((H, P), lambda b, t: (0, 0)),              # W_linear
            pl.BlockSpec((1, P), lambda b, t: (0, 0)),              # b_linear (f32)
        ],
        out_specs=pl.BlockSpec((1, tile_t, P), lambda b, t: (b, t, 0)),
        compiler_params=pltpu.CompilerParams(
            dimension_semantics=("parallel", "parallel"),
            vmem_limit_bytes=48 * 1024 * 1024,
        ),
        cost_estimate=cost,
    )(x, shift, scale1, w_lin_k, b_lin_k)


def _reference(x, c, w_ada, b_ada, w_lin, b_lin):
    """Plain-JAX f32 reference of the PyTorch forward."""
    x, c, w_ada, b_ada, w_lin, b_lin = (
        a.astype(jnp.float32) for a in (x, c, w_ada, b_ada, w_lin, b_lin))
    s = c * jax.nn.sigmoid(c)
    mod = s @ w_ada + b_ada                       # (B, 2H)
    H = x.shape[-1]
    shift = mod[:, None, :H]
    scale = mod[:, None, H:]
    mean = jnp.mean(x, axis=-1, keepdims=True)
    var = jnp.mean((x - mean) ** 2, axis=-1, keepdims=True)
    xn = (x - mean) / jnp.sqrt(var + 1e-6)
    y = xn * (1.0 + scale) + shift
    return y @ w_lin + b_lin


if __name__ == "__main__":
    # Module hyperparameters (small, consistent with FinalLayer.__init__).
    hidden_size = 32
    cond_dim = 16
    patch_size = 2
    out_channels = 4
    P = patch_size * patch_size * out_channels   # 16
    B, T = 2, 8

    key = jax.random.PRNGKey(0)
    k_x, k_c, k_wa, k_ba, k_wl, k_bl = jax.random.split(key, 6)

    dt = jnp.bfloat16   # bf16 end-to-end (HBM-bound path); f32 stats inside the kernel
    x = jax.random.normal(k_x, (B, T, hidden_size), dtype=jnp.float32).astype(dt)
    c = jax.random.normal(k_c, (B, cond_dim), dtype=jnp.float32).astype(dt)

    # Weights stored transposed vs. torch: (in, out).
    w_ada = (0.1 * jax.random.normal(k_wa, (cond_dim, 2 * hidden_size),
                                     dtype=jnp.float32)).astype(dt)
    b_ada = (0.1 * jax.random.normal(k_ba, (2 * hidden_size,),
                                     dtype=jnp.float32)).astype(dt)
    w_lin = (0.1 * jax.random.normal(k_wl, (hidden_size, P),
                                     dtype=jnp.float32)).astype(dt)
    b_lin = (0.1 * jax.random.normal(k_bl, (P,), dtype=jnp.float32)).astype(dt)

    out = final_layer(x, c, w_ada, b_ada, w_lin, b_lin)
    out = jax.block_until_ready(out)

    ref = _reference(x, c, w_ada, b_ada, w_lin, b_lin)
    assert out.shape == (B, T, P)
    assert out.dtype == x.dtype
    err = float(jnp.max(jnp.abs(out.astype(jnp.float32) - ref)))
    assert jnp.allclose(out.astype(jnp.float32), ref, atol=4e-2, rtol=4e-2), \
        f"mismatch vs reference, max abs err = {err}"

    print("KERNEL_OK")
</pallas_src>

<mosaic_0001>
module attributes {stable_mosaic.version = 11 : i64} {
  func.func @_final_kernel(%arg0: i32, %arg1: i32, %arg2: memref<1x8x32xbf16, #tpu.memory_space<vmem>>, %arg3: memref<1x1x32xf32, #tpu.memory_space<vmem>>, %arg4: memref<1x1x32xf32, #tpu.memory_space<vmem>>, %arg5: memref<32x16xbf16, #tpu.memory_space<vmem>>, %arg6: memref<1x16xf32, #tpu.memory_space<vmem>>, %arg7: memref<1x8x16xbf16, #tpu.memory_space<vmem>>) attributes {dimension_semantics = [#tpu.dimension_semantics<parallel>, #tpu.dimension_semantics<parallel>], iteration_bounds = array<i64: 2, 1>, scalar_prefetch = 0 : i64, scratch_operands = 0 : i64, tpu.core_type = #tpu.core_type<tc>, window_params = [{transform_indices = @transform_0, window_bounds = array<i64: 1, 8, 32>}, {transform_indices = @transform_1, window_bounds = array<i64: 1, 1, 32>}, {transform_indices = @transform_2, window_bounds = array<i64: 1, 1, 32>}, {pipeline_mode = #tpu.pipeline_mode<synchronous>, transform_indices = @transform_3, window_bounds = array<i64: 32, 16>}, {pipeline_mode = #tpu.pipeline_mode<synchronous>, transform_indices = @transform_4, window_bounds = array<i64: 1, 16>}, {transform_indices = @transform_5, window_bounds = array<i64: 1, 8, 16>}]} {
    %c0 = arith.constant 0 : index
    %c0_0 = arith.constant 0 : index
    %c0_1 = arith.constant 0 : index
    %0 = vector.load %arg2[%c0, %c0_0, %c0_1] : memref<1x8x32xbf16, #tpu.memory_space<vmem>>, vector<1x8x32xbf16>
    %1 = vector.shape_cast %0 : vector<1x8x32xbf16> to vector<8x32xbf16>
    %2 = arith.extf %1 : vector<8x32xbf16> to vector<8x32xf32>
    %cst = arith.constant dense<0.000000e+00> : vector<8xf32>
    %3 = vector.multi_reduction <add>, %2, %cst [1] : vector<8x32xf32> to vector<8xf32>
    %4 = vector.shape_cast %3 : vector<8xf32> to vector<8x1xf32>
    %cst_2 = arith.constant 3.200000e+01 : f32
    %5 = vector.broadcast %cst_2 : f32 to vector<8x1xf32>
    %6 = arith.divf %4, %5 : vector<8x1xf32>
    %7 = arith.mulf %2, %2 : vector<8x32xf32>
    %cst_3 = arith.constant dense<0.000000e+00> : vector<8xf32>
    %8 = vector.multi_reduction <add>, %7, %cst_3 [1] : vector<8x32xf32> to vector<8xf32>
    %9 = vector.shape_cast %8 : vector<8xf32> to vector<8x1xf32>
    %cst_4 = arith.constant 3.200000e+01 : f32
    %10 = vector.broadcast %cst_4 : f32 to vector<8x1xf32>
    %11 = arith.divf %9, %10 : vector<8x1xf32>
    %12 = arith.mulf %6, %6 : vector<8x1xf32>
    %13 = arith.subf %11, %12 : vector<8x1xf32>
    %cst_5 = arith.constant 0.000000e+00 : f32
    %14 = vector.broadcast %cst_5 : f32 to vector<8x1xf32>
    %15 = arith.maximumf %13, %14 : vector<8x1xf32>
    %cst_6 = arith.constant 9.99999997E-7 : f32
    %16 = vector.broadcast %cst_6 : f32 to vector<8x1xf32>
    %17 = arith.addf %15, %16 : vector<8x1xf32>
    %18 = math.rsqrt %17 : vector<8x1xf32>
    %19 = arith.truncf %6 : vector<8x1xf32> to vector<8x1xbf16>
    %20 = vector.broadcast %19 : vector<8x1xbf16> to vector<8x32xbf16>
    %21 = arith.subf %1, %20 : vector<8x32xbf16>
    %22 = arith.truncf %18 : vector<8x1xf32> to vector<8x1xbf16>
    %23 = vector.broadcast %22 : vector<8x1xbf16> to vector<8x32xbf16>
    %24 = arith.mulf %21, %23 : vector<8x32xbf16>
    %c0_7 = arith.constant 0 : index
    %c0_8 = arith.constant 0 : index
    %c0_9 = arith.constant 0 : index
    %25 = vector.load %arg4[%c0_7, %c0_8, %c0_9] : memref<1x1x32xf32, #tpu.memory_space<vmem>>, vector<1x1x32xf32>
    %26 = vector.shape_cast %25 : vector<1x1x32xf32> to vector<1x32xf32>
    %27 = arith.truncf %26 : vector<1x32xf32> to vector<1x32xbf16>
    %28 = vector.broadcast %27 : vector<1x32xbf16> to vector<8x32xbf16>
    %29 = arith.mulf %24, %28 : vector<8x32xbf16>
    %c0_10 = arith.constant 0 : index
    %c0_11 = arith.constant 0 : index
    %c0_12 = arith.constant 0 : index
    %30 = vector.load %arg3[%c0_10, %c0_11, %c0_12] : memref<1x1x32xf32, #tpu.memory_space<vmem>>, vector<1x1x32xf32>
    %31 = vector.shape_cast %30 : vector<1x1x32xf32> to vector<1x32xf32>
    %32 = arith.truncf %31 : vector<1x32xf32> to vector<1x32xbf16>
    %33 = vector.broadcast %32 : vector<1x32xbf16> to vector<8x32xbf16>
    %34 = arith.addf %29, %33 : vector<8x32xbf16>
    %c0_13 = arith.constant 0 : index
    %c0_14 = arith.constant 0 : index
    %35 = vector.load %arg5[%c0_13, %c0_14] : memref<32x16xbf16, #tpu.memory_space<vmem>>, vector<32x16xbf16>
    %cst_15 = arith.constant dense<0.000000e+00> : vector<8x16xf32>
    %36 = tpu.matmul %34, %35, %cst_15 {dimension_numbers = #tpu.dot_dimension_numbers<[1], [0], [0], [1], [0, 0, 1, 1], [], []>} : vector<8x32xbf16>, vector<32x16xbf16>, vector<8x16xf32> -> vector<8x16xf32>
    %c0_16 = arith.constant 0 : index
    %c0_17 = arith.constant 0 : index
    %37 = vector.load %arg6[%c0_16, %c0_17] : memref<1x16xf32, #tpu.memory_space<vmem>>, vector<1x16xf32>
    %38 = vector.broadcast %37 : vector<1x16xf32> to vector<8x16xf32>
    %39 = arith.addf %36, %38 : vector<8x16xf32>
    %40 = arith.truncf %39 : vector<8x16xf32> to vector<8x16xbf16>
    %c0_18 = arith.constant 0 : index
    %c0_19 = arith.constant 0 : index
    %c0_20 = arith.constant 0 : index
    %41 = vector.load %arg7[%c0_18, %c0_19, %c0_20] : memref<1x8x16xbf16, #tpu.memory_space<vmem>>, vector<1x8x16xbf16>
    %42 = vector.shape_cast %41 : vector<1x8x16xbf16> to vector<8x16xbf16>
    %43 = vector.shape_cast %40 : vector<8x16xbf16> to vector<1x8x16xbf16>
    tpu.vector_store %arg7[%c0_18, %c0_19, %c0_20], %43 {strides = array<i32>} : memref<1x8x16xbf16, #tpu.memory_space<vmem>>, vector<1x8x16xbf16>,
    return
  }
  func.func @transform_0(%arg0: i32, %arg1: i32) -> (i32, i32, i32) {
    %c0_i32 = arith.constant 0 : i32
    %c0_i32_0 = arith.constant 0 : i32
    return %arg0, %arg1, %c0_i32 : i32, i32, i32
  }
  func.func @transform_1(%arg0: i32, %arg1: i32) -> (i32, i32, i32) {
    %c0_i32 = arith.constant 0 : i32
    %c0_i32_0 = arith.constant 0 : i32
    %c0_i32_1 = arith.constant 0 : i32
    return %arg0, %c0_i32, %c0_i32_0 : i32, i32, i32
  }
  func.func @transform_2(%arg0: i32, %arg1: i32) -> (i32, i32, i32) {
    %c0_i32 = arith.constant 0 : i32
    %c0_i32_0 = arith.constant 0 : i32
    %c0_i32_1 = arith.constant 0 : i32
    return %arg0, %c0_i32, %c0_i32_0 : i32, i32, i32
  }
  func.func @transform_3(%arg0: i32, %arg1: i32) -> (i32, i32) {
    %c0_i32 = arith.constant 0 : i32
    %c0_i32_0 = arith.constant 0 : i32
    %c0_i32_1 = arith.constant 0 : i32
    return %c0_i32, %c0_i32_0 : i32, i32
  }
  func.func @transform_4(%arg0: i32, %arg1: i32) -> (i32, i32) {
    %c0_i32 = arith.constant 0 : i32
    %c0_i32_0 = arith.constant 0 : i32
    %c0_i32_1 = arith.constant 0 : i32
    return %c0_i32, %c0_i32_0 : i32, i32
  }
  func.func @transform_5(%arg0: i32, %arg1: i32) -> (i32, i32, i32) {
    %c0_i32 = arith.constant 0 : i32
    %c0_i32_0 = arith.constant 0 : i32
    return %arg0, %arg1, %c0_i32 : i32, i32, i32
  }
}

</mosaic_0001>

<bundles_post_ra>
// kernel: tpu_custom_call.1
= control target key start
LH: loop header
LB: loop body
LE: loop exit
PB: predicated region body
PF: predicated region fallthrough
CT: control target
= control target key end

     0   :  { %10 = vsyncpa [#allocation3], 0  ;;  %s824_s0 = inlined_call_operand.vmem [shape: bf16[2,8,32], index: 0, kind: input, shape index: {}]   ;;  %s825_s1 = inlined_call_operand.vmem [shape: f32[2,1,32], index: 1, kind: input, shape index: {}]   ;;  %s826_s2 = inlined_call_operand.vmem [shape: f32[2,1,32], index: 2, kind: input, shape index: {}]   ;;  %s827_s3 = inlined_call_operand.vmem [shape: bf16[32,16], index: 3, kind: input, shape index: {}]   ;;  %s828_s4 = inlined_call_operand.vmem [shape: f32[1,16], index: 4, kind: input, shape index: {}]   ;;  %s829_s5 = inlined_call_operand.hbm [shape: bf16[2,8,16], index: 5, kind: output, shape index: {}]  }
   0x1   :  { %12 = vsyncpa [#allocation3 + $0x1], 0  ;;  %s689_s18 = smov 0   ;;  %s691_s19 = smov 0  }
   0x2   :  { %s693_s20 = smov 0   ;;  %s695_s21 = smov 0  }
   0x3   :  { %s697_s22 = smov 0   ;;  %s699_s23 = smov 0  }
   0x4 LB: > { %s489_s24 = sadd.s32 4294967295, %s654_s23   ;;  %s490_s25 = sadd.s32 4294967294, %s654_s23   ;;  %s654_s23 = sphi %s699_s23, %s18_s23   ;;  %s650_s22 = sphi %s697_s22, %s836_s22   ;;  %s646_s21 = sphi %s695_s21, %s835_s21   ;;  %s642_s20 = sphi %s693_s20, %s834_s20   ;;  %s638_s19 = sphi %s691_s19, %s833_s19   ;;  %s634_s18 = sphi %s689_s18, %s832_s18  }
   0x5   : > { %s30_s26 = sadd.s32 1, %s650_s22  ;;  %s161_s27 = sadd.s32 1, %s642_s20 }
   0x6   : > { %p32_p0 = scmp.ge.s32.totalorder %s30_s26, 2  ;;  %p171_p1 = scmp.ne.s32.totalorder %s642_s20, %s638_s19 }
   0x7   : > { %p172_p2 = scmp.eq.s32.totalorder %s489_s24, 1  ;;  %p177_p3 = scmp.ne.s32.totalorder %s638_s19, %s634_s18 }
   0x8   : > { %s838_s26 = smov (%p32_p0, %s30_s26), 0  ;;  %p178_p5 = scmp.eq.s32.totalorder %s490_s25, 1 }
   0x9   : > { %p729_p4 = por %p172_p2, %p171_p1  ;;  %s156_s29 = ssub.s32 %s650_s22, %s838_s26 }
   0xa   : > { %p493_p6 = scmp.ge.s32.totalorder %s654_s23, 1  ;;  %p159_p7 = scmp.eq.s32.totalorder %s156_s29, 0 }
   0xb   : > { %p736_p8 = por %p178_p5, %p177_p3  ;;  %p224_p9 = scmp.lt.s32.totalorder %s654_s23, 3 }
   0xc   : > { %s742_s6 = scalar_select %p159_p7, %s642_s20, %s161_s27  }
   0xd   : > { %p225_p10 = pnand %p493_p6, %p224_p9 }
   0xe   : > { %p260_p11 = scmp.lt.s32.totalorder (!%p225_p10), %s646_s21, 1  ;;  %vm276_vm0 = vcmask (!%p225_p10), 261120   ;;  %v572_v5 = vld [vmem:[%s827_s3] sm:$0xff] (!%p225_p10)   ;;  %v656_v6 = vmov (!%p225_p10), 0.0   ;;  %v573_v7 = vld [vmem:[%s827_s3 + $0x8] sm:$0xff] (!%p225_p10)   ;;  %vm657_vm1 = vmmov (!%p225_p10), 0   ;;  %v301_v16 = vlaneseq (!%p225_p10) }
   0xf   : > { %228 = sbr.rel (%p225_p10) target bundleno = 433 (0x1b1), region = 40  ;;  %507 = vmatprep.subr.bf16.mxu0 (!%p225_p10), %v656_v6  ;;  %511 = vmatprep.mubr.msk.bf16.mxu0 (!%p225_p10), %vm657_vm1, %v656_v6  ;;  %v496_v34 = vld [vmem:[%s828_s4] ss:$0 sm:$0xff] (!%p225_p10)  ;;  %vm383_vm2 = vcmask (!%p225_p10), 125952  }
  0x10   : > { %508 = vmatpush3.bf16.msra.mxu0 (!%p225_p10), %v572_v5  ;;  %v302_v20 = vshrl.u32 (!%p225_p10), %v301_v16, 7 }
  0x11   : > { %509 = vmatprep.subr.bf16.mxu0 (!%p225_p10), %v656_v6 }
  0x12   : > { %v303_v24 = vsub.s32 (!%p225_p10), 0, %v302_v20 }
  0x14   : > { %510 = vmatpush3.bf16.msra.mxu0 (!%p225_p10), %v573_v7 }
  0x16   : > { %s746_s7 = scalar_select %p260_p11, %s646_s21, 1 }
  0x18   : > { %s495_s8 = sshll.u32 %s746_s7, 2  ;;  %s272_s24 = scalar_lea.vmem %s826_s2, %s746_s7 }
  0x19   : > { %s266_s11 = scalar_lea.vmem %s824_s0, %s495_s8  ;;  %s269_s29 = scalar_lea.vmem %s825_s1, %s746_s7  ;;  %v296_v17 = vld [vmem:[%s272_s24] sm:$0x1] }
  0x1a   : > { %v274_v0 = vld [vmem:[%s266_s11] sm:$0xf]  ;;  %v297_v19 = vpack.c.bf16 %v296_v17, %v296_v17  ;;  %s257_s7 = sand.u32 1, %s638_s19   ;;  %s501_s11 = sshll.u32 %s646_s21, 6 }
  0x1b   : > { %v275_v1 = vunpack.c.l.bf16 %v274_v0  ;;  %v306_v18 = vld [vmem:[%s269_s29] sm:$0x1]  ;;  %s494_s8 = sshll.u32 %s257_s7, 2  ;;  %s777_s16 = scalar_lea.hbm %s829_s5, %s501_s11 }
  0x1c   : > { %v307_v21 = vpack.c.bf16 %v306_v18, %v306_v18  ;;  %v299_v22 = vpack.i.b16 %v297_v19, %v297_v19  ;;  %s259_s12 = scalar_lea.vmem [#allocation2], %s494_s8  ;;  %s386_s21 = scalar_lea.sflag [#allocation3], %s257_s7 }
  0x1d   : > { %v277_v2 = vsel %vm276_vm0, %v275_v1, 0.0  ;;  %v282_v3 = vmul.f32 %v275_v1, %v275_v1  ;;  %s400_s13 = sshll.u32 %s259_s12, 4  ;;  %s658_s24 = smov [#allocation2]   ;;  %s779_s13 = int_to_ptr.vmem [resolvable:$true] %s400_s13 }
  0x1e   : > { %278 = vadd.xlane.f32.xlu0 %v277_v2  ;;  %v309_v25 = vpack.i.b16 %v307_v21, %v307_v21  ;;  %v304_v29 = vrot.slane %v299_v22, %v303_v24  ;;  %s576_s17 = scalar_lea.vmem %s779_s13, 64  ;;  %s580_s25 = sshll.u32 %s658_s24, 4  ;;  %s581_s25 = int_to_ptr.vmem [resolvable:$false] %s580_s25 }
  0x1f   : > { %v283_v4 = vsel %vm276_vm0, %v282_v3, 0.0  ;;  %p577_p12 = scmp.ne.s32.totalorder %s779_s13, %s576_s17  ;;  %s582_s27 = scalar_lea.vmem %s581_s25, 128 }
  0x20   : > { %v314_v31 = vrot.slane %v309_v25, %v303_v24  ;;  %p583_p1 = scmp.lt.s32.totalorder %s779_s13, %s581_s25  ;;  %p584_p2 = scmp.lt.s32.totalorder %s582_s27, %s576_s17 }
  0x21   : > { %p578_p13 = pnand %p577_p12, %p729_p4 }
  0x22   : > { %284 = vadd.xlane.f32.xlu0 %v283_v4  ;;  %p585_p3 = por %p584_p2, %p583_p1 }
  0x23   : > { %p579_p0 = pneg %p578_p13 }
  0x25   : > { %p586_p5 = pnand %p585_p3, %p579_p0 }
  0xab   : > { %v279_v8 = vpop.xlane.xlu0 %278 }
  0xac   : > { %v281_v9 = vmul.f32 0.03125, %v279_v8 }
  0xae   : > { %v287_v11 = vmul.f32 %v281_v9, %v281_v9  ;;  %v292_v23 = vpack.c.bf16 %v281_v9, %v281_v9 }
  0xaf   : > { %v285_v10 = vpop.xlane.xlu0 %284 }
  0xb0   : > { %v286_v12 = vmul.f32 0.03125, %v285_v10  ;;  %v293_v27 = vsub.bf16 %v274_v0, %v292_v23 }
  0xb2   : > { %v288_v13 = vsub.f32 %v286_v12, %v287_v11 }
  0xb4   : > { %v289_v14 = vmax.f32 %v288_v13, 0.0 }
  0xb6   : > { %v290_v15 = vadd.f32 1e-06, %v289_v14 }
  0xb8   : > { %574 = vrsqrt.f32 %v290_v15 }
  0xc2   : > { %v575_v26 = vpop.eup %574 }
  0xc3   : > { %v294_v28 = vpack.c.bf16 %v575_v26, %v575_v26 }
  0xc5   : > { %v295_v30 = vmul.bf16 %v294_v28, %v293_v27 }
  0xc7   : > { %v305_v32 = vmul.bf16 %v304_v29, %v295_v30 }
  0xc9   : > { %v315_v33 = vadd.bf16 %v314_v31, %v305_v32 }
  0xcb   : > { %512 = vmatmul.mubr.msk.bf16.vlgmr.msra.gmra.mrb[0].mxu0 %vm276_vm0, %v315_v33 }
 0x19e   : > { %v376_v35 = vpop.f32.mrb[0].mxu0 }
 0x19f   : > { %v377_v36 = vadd.f32 %v496_v34, %v376_v35  ;;  %v513_v37 = vpop.f32.mrb[1].mxu0 }
 0x1a0   : > { %v379_v38 = vpop.f32.mrb[2].mxu0 }
 0x1a1   : > { %v382_v39 = vpack.c.bf16 %v377_v36, %v377_v36  ;;  %v514_v40 = vpop.f32.mrb[3].mxu0 }
 0x1a3   : > { %384 = vst.msk [vmem:[%s259_s12] sm:$0xf] %vm383_vm2, %v382_v39 }
 0x1a4   : > { %589 = shalt.err (!%p586_p5)
}
 0x1a5   : > { %s590_s29 = scalar_lea.hbm %s777_s16, 64  ;;  %s594_s9 = scalar_lea.hbm %s829_s5, 128 }
 0x1a6   : > { %p591_p6 = scmp.ne.s32.totalorder %s777_s16, %s590_s29  ;;  %p595_p10 = scmp.lt.u32.totalorder %s777_s16, %s829_s5 }
 0x1a7   : > { %p596_p11 = scmp.lt.u32.totalorder %s594_s9, %s590_s29  ;;  %p598_p13 = scmp.lt.u32.totalorder %s590_s29, %s777_s16 }
 0x1a8   : > { %p592_p7 = pnand %p591_p6, %p729_p4 }
 0x1a9   : > { %p597_p12 = por %p596_p11, %p595_p10 }
 0x1aa   : > { %p593_p9 = pneg %p592_p7 }
 0x1ab   : > { %p599_p0 = por %p598_p13, %p597_p12 }
 0x1ad   : > { %p600_p1 = pnand %p599_p0, %p593_p9 }
 0x1af   : > { %603 = shalt.err (!%p600_p1)
}
 0x1b0   : > { %515 = dma.vmem_to_hbm [thread:$0]  (%p729_p4), %s779_s13, 64, %s777_s16, %s386_s21  }
 0x1b1 PF: > { %p521_p2 = scmp.ge.s32.totalorder %s654_s23, 2  ;;  %s412_s12 = sand.u32 1, %s634_s18  }
 0x1b2   : > { %s413_s14 = scalar_lea.sflag [#allocation3], %s412_s12 }
 0x1b3   : > { %p518_p3 = pnand %p521_p2, %p736_p8 }
 0x1b5   : > { %629 = dma.done.wait (!%p518_p3), %s413_s14, 64  }
 0x1b6   : > { %631 = vsyncadd (!%p518_p3), %s413_s14, 4294967232  ;;  %s18_s23 = sadd.s32 1, %s654_s23   ;;  %s832_s18 = smov %s638_s19 }
 0x1b7   : > { %p15_p5 = scmp.ge.s32.totalorder %s18_s23, 4   ;;  %s833_s19 = smov %s642_s20 }
 0x1b8   : > { %s834_s20 = smov %s742_s6  ;;  %s835_s21 = smov %s650_s22 }
 0x1b9   : > { %s836_s22 = smov %s838_s26  ;;  %17 = sbr.rel (!%p15_p5) target bundleno = 4 (0x4), region = 81 }
 0x1c0   :  { %418 = vsyncpa [#allocation3], 1 }
 0x1c1   :  { %420 = vsyncpa [#allocation3 + $0x1], 1 }

</bundles_post_ra>
